<compile_context>
chip_gen: v7x
topology: tpu7x:2x2x1
jax: 0.10.0
libtpu: 0.0.40
codegen_flags: <defaults>
</compile_context>

<pallas_src>
import math
import functools

import jax
import jax.numpy as jnp
from jax import lax
from jax.experimental import pallas as pl
from jax.experimental.pallas import tpu as pltpu


_MASK_NEG = jnp.float32(-1e30)   # finite "minus infinity" for additive masking


def head_attention_kernel(x_ref, maskadd_ref, wq_ref, bq_ref, wkv_ref, bkv_ref,
                          o_ref, *, n_embd_head, q_tile):
    Dh = n_embd_head
    qi = pl.program_id(1)
    q_start = pl.multiple_of(qi * q_tile, q_tile)

    # Full sequence block for this batch element (bf16) and the query tile.
    x_full = x_ref[0]                                   # (T, E)  bf16
    x_q = x_ref[0, pl.ds(q_start, q_tile), :]           # (TQ, E) bf16

    # Q projection for this query tile. 1/sqrt(Dh) is pre-folded into wq/bq.
    q = jnp.dot(x_q, wq_ref[...],
                preferred_element_type=jnp.float32) + bq_ref[...]      # (TQ, Dh) f32

    # Fused K|V projection over the full sequence.
    kv = jnp.dot(x_full, wkv_ref[...],
                 preferred_element_type=jnp.float32) + bkv_ref[...]    # (T, 2Dh) f32
    k = kv[:, :Dh]
    v = kv[:, Dh:]

    # q @ k^T without materializing a transpose: contract over Dh on the MXU.
    att = lax.dot_general(
        q.astype(jnp.bfloat16), k.astype(jnp.bfloat16),
        dimension_numbers=(((1,), (1,)), ((), ())),
        preferred_element_type=jnp.float32)                            # (TQ, T) f32

    # Additive padding mask (0 or -1e30 per key), broadcast over queries.
    att = att + maskadd_ref[0]                                         # (1, T) -> (TQ, T)

    # f32 softmax with normalization deferred until after the PV matmul.
    att = att - jnp.max(att, axis=-1, keepdims=True)
    p = jnp.exp(att)                                                   # (TQ, T) f32
    denom = jnp.sum(p, axis=-1, keepdims=True)                         # (TQ, 1) f32

    # attention dropout: eval mode -> identity

    pv = jnp.dot(p.astype(jnp.bfloat16), v.astype(jnp.bfloat16),
                 preferred_element_type=jnp.float32)                   # (TQ, Dh) f32

    o_ref[0] = (pv * pl.reciprocal(denom, approx=True)).astype(o_ref.dtype)


def head_attention(x, padding_mask, params, n_embd_head, *, q_tile=None):
    """x: (B, T, E) f32, padding_mask: (B, T) bool/int. Returns (B, T, Dh) f32."""
    B, T, E = x.shape
    Dh = n_embd_head
    out_dtype = x.dtype

    # Query-tile size: whole sequence for moderate T, otherwise a multiple of 8
    # that divides T (bounds VMEM to O(TQ*T + T*E) for long sequences).
    if q_tile is None:
        q_tile = T if T <= 1024 else 512
    assert T % q_tile == 0
    assert q_tile == T or q_tile % 8 == 0
    nq = T // q_tile

    scale = 1.0 / math.sqrt(Dh)

    # PyTorch Linear stores weight as (out, in); transpose so the kernel does
    # x @ W.  Fold the softmax scale into the Q projection; fuse K|V weights.
    wq = (params["wq"].T * scale).astype(jnp.bfloat16)                    # (E, Dh)
    bq = (params["bq"] * scale).reshape(1, Dh).astype(jnp.float32)        # (1, Dh)
    wkv = jnp.concatenate([params["wk"].T, params["wv"].T], axis=1
                          ).astype(jnp.bfloat16)                          # (E, 2Dh)
    bkv = jnp.concatenate([params["bk"], params["bv"]]
                          ).reshape(1, 2 * Dh).astype(jnp.float32)        # (1, 2Dh)

    x_bf16 = x.astype(jnp.bfloat16)
    mask_add = jnp.where(padding_mask, _MASK_NEG, jnp.float32(0.0)
                         ).reshape(B, 1, T)                               # (B, 1, T)

    kernel = functools.partial(head_attention_kernel,
                               n_embd_head=Dh, q_tile=q_tile)

    def build(single_buffer_weights):
        if single_buffer_weights:
            # Weight/bias block indices never change across the grid -> no need
            # for the default double buffer.
            def wspec(shape):
                return pl.BlockSpec(shape, lambda b, i: (0, 0),
                                    pipeline_mode=pl.Buffered(1))
        else:
            def wspec(shape):
                return pl.BlockSpec(shape, lambda b, i: (0, 0))

        return pl.pallas_call(
            kernel,
            out_shape=jax.ShapeDtypeStruct((B, T, Dh), out_dtype),
            grid_spec=pltpu.PrefetchScalarGridSpec(
                num_scalar_prefetch=0,
                grid=(B, nq),
                in_specs=[
                    pl.BlockSpec((1, T, E), lambda b, i: (b, 0, 0)),   # x (full seq)
                    pl.BlockSpec((1, 1, T), lambda b, i: (b, 0, 0)),   # additive mask
                    wspec((E, Dh)),                                    # wq (scaled)
                    wspec((1, Dh)),                                    # bq (scaled)
                    wspec((E, 2 * Dh)),                                # wk|wv fused
                    wspec((1, 2 * Dh)),                                # bk|bv fused
                ],
                out_specs=pl.BlockSpec((1, q_tile, Dh), lambda b, i: (b, i, 0)),
            ),
            compiler_params=pltpu.CompilerParams(
                dimension_semantics=("parallel", "parallel"),
                vmem_limit_bytes=32 * 1024 * 1024,
            ),
        )

    args = (x_bf16, mask_add, wq, bq, wkv, bkv)
    try:
        return build(True)(*args)
    except Exception:
        # pipeline_mode=pl.Buffered(1) not supported by this JAX version --
        # fall back to default (double-buffered) weight blocks.
        return build(False)(*args)


def reference(x, padding_mask, params, n_embd_head):
    q = x @ params["wq"].T + params["bq"]
    k = x @ params["wk"].T + params["bk"]
    v = x @ params["wv"].T + params["bv"]
    att = q @ jnp.swapaxes(k, -2, -1) * (1.0 / math.sqrt(n_embd_head))
    att = jnp.where(padding_mask[:, None, :], -jnp.inf, att)
    att = jax.nn.softmax(att, axis=-1)
    return att @ v


if __name__ == "__main__":
    B, T, n_embd, n_embd_head = 2, 8, 32, 16

    key = jax.random.PRNGKey(0)
    kx, kwq, kbq, kwk, kbk, kwv, kbv = jax.random.split(key, 7)

    x = jax.random.normal(kx, (B, T, n_embd), dtype=jnp.float32)
    # padding mask: True == masked key position (as in masked_fill). Keep the
    # first positions unmasked so every softmax row has at least one valid key.
    padding_mask = jnp.concatenate(
        [jnp.zeros((B, T - 2), dtype=bool), jnp.ones((B, 2), dtype=bool)], axis=1)

    bound = 1.0 / math.sqrt(n_embd)   # PyTorch Linear default init range
    params = {
        "wq": jax.random.uniform(kwq, (n_embd_head, n_embd), jnp.float32, -bound, bound),
        "bq": jax.random.uniform(kbq, (n_embd_head,), jnp.float32, -bound, bound),
        "wk": jax.random.uniform(kwk, (n_embd_head, n_embd), jnp.float32, -bound, bound),
        "bk": jax.random.uniform(kbk, (n_embd_head,), jnp.float32, -bound, bound),
        "wv": jax.random.uniform(kwv, (n_embd_head, n_embd), jnp.float32, -bound, bound),
        "bv": jax.random.uniform(kbv, (n_embd_head,), jnp.float32, -bound, bound),
    }

    out = head_attention(x, padding_mask, params, n_embd_head)
    out = jax.block_until_ready(out)

    ref = reference(x, padding_mask, params, n_embd_head)
    assert out.shape == (B, T, n_embd_head)
    # bf16 matmul operands (f32 accumulation) -> looser tolerance than pure f32.
    assert jnp.allclose(out, ref, atol=3e-2, rtol=3e-2), (
        f"max abs err {jnp.max(jnp.abs(out - ref))}")

    print("KERNEL_OK")
</pallas_src>

<mosaic_0001>
module attributes {stable_mosaic.version = 11 : i64} {
  func.func @head_attention_kernel(%arg0: i32, %arg1: i32, %arg2: memref<1x8x32xbf16, #tpu.memory_space<vmem>>, %arg3: memref<1x1x8xf32, #tpu.memory_space<vmem>>, %arg4: memref<32x16xbf16, #tpu.memory_space<vmem>>, %arg5: memref<1x16xf32, #tpu.memory_space<vmem>>, %arg6: memref<32x32xbf16, #tpu.memory_space<vmem>>, %arg7: memref<1x32xf32, #tpu.memory_space<vmem>>, %arg8: memref<1x8x16xf32, #tpu.memory_space<vmem>>) attributes {dimension_semantics = [#tpu.dimension_semantics<parallel>, #tpu.dimension_semantics<parallel>], iteration_bounds = array<i64: 2, 1>, scalar_prefetch = 0 : i64, scratch_operands = 0 : i64, tpu.core_type = #tpu.core_type<tc>, window_params = [{transform_indices = @transform_0, window_bounds = array<i64: 1, 8, 32>}, {transform_indices = @transform_1, window_bounds = array<i64: 1, 1, 8>}, {pipeline_mode = #tpu.pipeline_mode<synchronous>, transform_indices = @transform_2, window_bounds = array<i64: 32, 16>}, {pipeline_mode = #tpu.pipeline_mode<synchronous>, transform_indices = @transform_3, window_bounds = array<i64: 1, 16>}, {pipeline_mode = #tpu.pipeline_mode<synchronous>, transform_indices = @transform_4, window_bounds = array<i64: 32, 32>}, {pipeline_mode = #tpu.pipeline_mode<synchronous>, transform_indices = @transform_5, window_bounds = array<i64: 1, 32>}, {transform_indices = @transform_6, window_bounds = array<i64: 1, 8, 16>}]} {
    %c8_i32 = arith.constant 8 : i32
    %0 = arith.muli %arg1, %c8_i32 : i32
    %1 = tpu.assume_multiple %0, 8 : i32
    %c0 = arith.constant 0 : index
    %c0_0 = arith.constant 0 : index
    %c0_1 = arith.constant 0 : index
    %2 = vector.load %arg2[%c0, %c0_0, %c0_1] : memref<1x8x32xbf16, #tpu.memory_space<vmem>>, vector<1x8x32xbf16>
    %3 = vector.shape_cast %2 : vector<1x8x32xbf16> to vector<8x32xbf16>
    %c0_2 = arith.constant 0 : index
    %4 = arith.index_cast %1 : i32 to index
    %c0_3 = arith.constant 0 : index
    %5 = vector.load %arg2[%c0_2, %4, %c0_3] : memref<1x8x32xbf16, #tpu.memory_space<vmem>>, vector<1x8x32xbf16>
    %6 = vector.shape_cast %5 : vector<1x8x32xbf16> to vector<8x32xbf16>
    %c0_4 = arith.constant 0 : index
    %c0_5 = arith.constant 0 : index
    %7 = vector.load %arg4[%c0_4, %c0_5] : memref<32x16xbf16, #tpu.memory_space<vmem>>, vector<32x16xbf16>
    %cst = arith.constant dense<0.000000e+00> : vector<8x16xf32>
    %8 = tpu.matmul %6, %7, %cst {dimension_numbers = #tpu.dot_dimension_numbers<[1], [0], [0], [1], [0, 0, 1, 1], [], []>} : vector<8x32xbf16>, vector<32x16xbf16>, vector<8x16xf32> -> vector<8x16xf32>
    %c0_6 = arith.constant 0 : index
    %c0_7 = arith.constant 0 : index
    %9 = vector.load %arg5[%c0_6, %c0_7] : memref<1x16xf32, #tpu.memory_space<vmem>>, vector<1x16xf32>
    %10 = vector.broadcast %9 : vector<1x16xf32> to vector<8x16xf32>
    %11 = arith.addf %8, %10 : vector<8x16xf32>
    %c0_8 = arith.constant 0 : index
    %c0_9 = arith.constant 0 : index
    %12 = vector.load %arg6[%c0_8, %c0_9] : memref<32x32xbf16, #tpu.memory_space<vmem>>, vector<32x32xbf16>
    %cst_10 = arith.constant dense<0.000000e+00> : vector<8x32xf32>
    %13 = tpu.matmul %3, %12, %cst_10 {dimension_numbers = #tpu.dot_dimension_numbers<[1], [0], [0], [1], [0, 0, 1, 1], [], []>} : vector<8x32xbf16>, vector<32x32xbf16>, vector<8x32xf32> -> vector<8x32xf32>
    %c0_11 = arith.constant 0 : index
    %c0_12 = arith.constant 0 : index
    %14 = vector.load %arg7[%c0_11, %c0_12] : memref<1x32xf32, #tpu.memory_space<vmem>>, vector<1x32xf32>
    %15 = vector.broadcast %14 : vector<1x32xf32> to vector<8x32xf32>
    %16 = arith.addf %13, %15 : vector<8x32xf32>
    %17 = vector.extract_strided_slice %16 {offsets = [0, 0], sizes = [8, 16], strides = [1, 1]} : vector<8x32xf32> to vector<8x16xf32>
    %18 = vector.extract_strided_slice %16 {offsets = [0, 16], sizes = [8, 16], strides = [1, 1]} : vector<8x32xf32> to vector<8x16xf32>
    %19 = arith.truncf %11 : vector<8x16xf32> to vector<8x16xbf16>
    %20 = arith.truncf %17 : vector<8x16xf32> to vector<8x16xbf16>
    %cst_13 = arith.constant dense<0.000000e+00> : vector<8x8xf32>
    %21 = tpu.matmul %19, %20, %cst_13 {dimension_numbers = #tpu.dot_dimension_numbers<[1], [1], [0], [0], [0, 0, 1, 0], [], []>} : vector<8x16xbf16>, vector<8x16xbf16>, vector<8x8xf32> -> vector<8x8xf32>
    %c0_14 = arith.constant 0 : index
    %c0_15 = arith.constant 0 : index
    %c0_16 = arith.constant 0 : index
    %22 = vector.load %arg3[%c0_14, %c0_15, %c0_16] : memref<1x1x8xf32, #tpu.memory_space<vmem>>, vector<1x1x8xf32>
    %23 = vector.shape_cast %22 : vector<1x1x8xf32> to vector<1x8xf32>
    %24 = vector.broadcast %23 : vector<1x8xf32> to vector<8x8xf32>
    %25 = arith.addf %21, %24 : vector<8x8xf32>
    %cst_17 = arith.constant dense<0xFF800000> : vector<8xf32>
    %26 = vector.multi_reduction <maximumf>, %25, %cst_17 [1] : vector<8x8xf32> to vector<8xf32>
    %27 = vector.shape_cast %26 : vector<8xf32> to vector<8x1xf32>
    %28 = vector.broadcast %27 : vector<8x1xf32> to vector<8x8xf32>
    %29 = arith.subf %25, %28 : vector<8x8xf32>
    %30 = math.exp %29 : vector<8x8xf32>
    %cst_18 = arith.constant dense<0.000000e+00> : vector<8xf32>
    %31 = vector.multi_reduction <add>, %30, %cst_18 [1] : vector<8x8xf32> to vector<8xf32>
    %32 = vector.shape_cast %31 : vector<8xf32> to vector<8x1xf32>
    %33 = arith.truncf %30 : vector<8x8xf32> to vector<8x8xbf16>
    %34 = arith.truncf %18 : vector<8x16xf32> to vector<8x16xbf16>
    %cst_19 = arith.constant dense<0.000000e+00> : vector<8x16xf32>
    %35 = tpu.matmul %33, %34, %cst_19 {dimension_numbers = #tpu.dot_dimension_numbers<[1], [0], [0], [1], [0, 0, 1, 1], [], []>} : vector<8x8xbf16>, vector<8x16xbf16>, vector<8x16xf32> -> vector<8x16xf32>
    %36 = tpu.reciprocal %32 {approx = true} : vector<8x1xf32> -> vector<8x1xf32>
    %37 = vector.broadcast %36 : vector<8x1xf32> to vector<8x16xf32>
    %38 = arith.mulf %35, %37 : vector<8x16xf32>
    %c0_20 = arith.constant 0 : index
    %c0_21 = arith.constant 0 : index
    %c0_22 = arith.constant 0 : index
    %39 = vector.load %arg8[%c0_20, %c0_21, %c0_22] : memref<1x8x16xf32, #tpu.memory_space<vmem>>, vector<1x8x16xf32>
    %40 = vector.shape_cast %39 : vector<1x8x16xf32> to vector<8x16xf32>
    %41 = vector.shape_cast %38 : vector<8x16xf32> to vector<1x8x16xf32>
    tpu.vector_store %arg8[%c0_20, %c0_21, %c0_22], %41 {strides = array<i32>} : memref<1x8x16xf32, #tpu.memory_space<vmem>>, vector<1x8x16xf32>,
    return
  }
  func.func @transform_0(%arg0: i32, %arg1: i32) -> (i32, i32, i32) {
    %c0_i32 = arith.constant 0 : i32
    %c0_i32_0 = arith.constant 0 : i32
    %c0_i32_1 = arith.constant 0 : i32
    return %arg0, %c0_i32, %c0_i32_0 : i32, i32, i32
  }
  func.func @transform_1(%arg0: i32, %arg1: i32) -> (i32, i32, i32) {
    %c0_i32 = arith.constant 0 : i32
    %c0_i32_0 = arith.constant 0 : i32
    %c0_i32_1 = arith.constant 0 : i32
    return %arg0, %c0_i32, %c0_i32_0 : i32, i32, i32
  }
  func.func @transform_2(%arg0: i32, %arg1: i32) -> (i32, i32) {
    %c0_i32 = arith.constant 0 : i32
    %c0_i32_0 = arith.constant 0 : i32
    %c0_i32_1 = arith.constant 0 : i32
    return %c0_i32, %c0_i32_0 : i32, i32
  }
  func.func @transform_3(%arg0: i32, %arg1: i32) -> (i32, i32) {
    %c0_i32 = arith.constant 0 : i32
    %c0_i32_0 = arith.constant 0 : i32
    %c0_i32_1 = arith.constant 0 : i32
    return %c0_i32, %c0_i32_0 : i32, i32
  }
  func.func @transform_4(%arg0: i32, %arg1: i32) -> (i32, i32) {
    %c0_i32 = arith.constant 0 : i32
    %c0_i32_0 = arith.constant 0 : i32
    %c0_i32_1 = arith.constant 0 : i32
    return %c0_i32, %c0_i32_0 : i32, i32
  }
  func.func @transform_5(%arg0: i32, %arg1: i32) -> (i32, i32) {
    %c0_i32 = arith.constant 0 : i32
    %c0_i32_0 = arith.constant 0 : i32
    %c0_i32_1 = arith.constant 0 : i32
    return %c0_i32, %c0_i32_0 : i32, i32
  }
  func.func @transform_6(%arg0: i32, %arg1: i32) -> (i32, i32, i32) {
    %c0_i32 = arith.constant 0 : i32
    %c0_i32_0 = arith.constant 0 : i32
    return %arg0, %arg1, %c0_i32 : i32, i32, i32
  }
}

module attributes {stable_mosaic.version = 11 : i64} {
  func.func @head_attention_kernel(%arg0: i32, %arg1: i32, %arg2: memref<1x8x32xbf16, #tpu.memory_space<vmem>>, %arg3: memref<1x1x8xf32, #tpu.memory_space<vmem>>, %arg4: memref<32x16xbf16, #tpu.memory_space<vmem>>, %arg5: memref<1x16xf32, #tpu.memory_space<vmem>>, %arg6: memref<32x32xbf16, #tpu.memory_space<vmem>>, %arg7: memref<1x32xf32, #tpu.memory_space<vmem>>, %arg8: memref<1x8x16xf32, #tpu.memory_space<vmem>>) attributes {dimension_semantics = [#tpu.dimension_semantics<parallel>, #tpu.dimension_semantics<parallel>], iteration_bounds = array<i64: 2, 1>, scalar_prefetch = 0 : i64, scratch_operands = 0 : i64, tpu.core_type = #tpu.core_type<tc>, window_params = [{transform_indices = @transform_0, window_bounds = array<i64: 1, 8, 32>}, {transform_indices = @transform_1, window_bounds = array<i64: 1, 1, 8>}, {pipeline_mode = #tpu.pipeline_mode<synchronous>, transform_indices = @transform_2, window_bounds = array<i64: 32, 16>}, {pipeline_mode = #tpu.pipeline_mode<synchronous>, transform_indices = @transform_3, window_bounds = array<i64: 1, 16>}, {pipeline_mode = #tpu.pipeline_mode<synchronous>, transform_indices = @transform_4, window_bounds = array<i64: 32, 32>}, {pipeline_mode = #tpu.pipeline_mode<synchronous>, transform_indices = @transform_5, window_bounds = array<i64: 1, 32>}, {transform_indices = @transform_6, window_bounds = array<i64: 1, 8, 16>}]} {
    %c8_i32 = arith.constant 8 : i32
    %0 = arith.muli %arg1, %c8_i32 : i32
    %1 = tpu.assume_multiple %0, 8 : i32
    %c0 = arith.constant 0 : index
    %c0_0 = arith.constant 0 : index
    %c0_1 = arith.constant 0 : index
    %2 = vector.load %arg2[%c0, %c0_0, %c0_1] : memref<1x8x32xbf16, #tpu.memory_space<vmem>>, vector<1x8x32xbf16>
    %3 = vector.shape_cast %2 : vector<1x8x32xbf16> to vector<8x32xbf16>
    %c0_2 = arith.constant 0 : index
    %4 = arith.index_cast %1 : i32 to index
    %c0_3 = arith.constant 0 : index
    %5 = vector.load %arg2[%c0_2, %4, %c0_3] : memref<1x8x32xbf16, #tpu.memory_space<vmem>>, vector<1x8x32xbf16>
    %6 = vector.shape_cast %5 : vector<1x8x32xbf16> to vector<8x32xbf16>
    %c0_4 = arith.constant 0 : index
    %c0_5 = arith.constant 0 : index
    %7 = vector.load %arg4[%c0_4, %c0_5] : memref<32x16xbf16, #tpu.memory_space<vmem>>, vector<32x16xbf16>
    %cst = arith.constant dense<0.000000e+00> : vector<8x16xf32>
    %8 = tpu.matmul %6, %7, %cst {dimension_numbers = #tpu.dot_dimension_numbers<[1], [0], [0], [1], [0, 0, 1, 1], [], []>} : vector<8x32xbf16>, vector<32x16xbf16>, vector<8x16xf32> -> vector<8x16xf32>
    %c0_6 = arith.constant 0 : index
    %c0_7 = arith.constant 0 : index
    %9 = vector.load %arg5[%c0_6, %c0_7] : memref<1x16xf32, #tpu.memory_space<vmem>>, vector<1x16xf32>
    %10 = vector.broadcast %9 : vector<1x16xf32> to vector<8x16xf32>
    %11 = arith.addf %8, %10 : vector<8x16xf32>
    %c0_8 = arith.constant 0 : index
    %c0_9 = arith.constant 0 : index
    %12 = vector.load %arg6[%c0_8, %c0_9] : memref<32x32xbf16, #tpu.memory_space<vmem>>, vector<32x32xbf16>
    %cst_10 = arith.constant dense<0.000000e+00> : vector<8x32xf32>
    %13 = tpu.matmul %3, %12, %cst_10 {dimension_numbers = #tpu.dot_dimension_numbers<[1], [0], [0], [1], [0, 0, 1, 1], [], []>} : vector<8x32xbf16>, vector<32x32xbf16>, vector<8x32xf32> -> vector<8x32xf32>
    %c0_11 = arith.constant 0 : index
    %c0_12 = arith.constant 0 : index
    %14 = vector.load %arg7[%c0_11, %c0_12] : memref<1x32xf32, #tpu.memory_space<vmem>>, vector<1x32xf32>
    %15 = vector.broadcast %14 : vector<1x32xf32> to vector<8x32xf32>
    %16 = arith.addf %13, %15 : vector<8x32xf32>
    %17 = vector.extract_strided_slice %16 {offsets = [0, 0], sizes = [8, 16], strides = [1, 1]} : vector<8x32xf32> to vector<8x16xf32>
    %18 = vector.extract_strided_slice %16 {offsets = [0, 16], sizes = [8, 16], strides = [1, 1]} : vector<8x32xf32> to vector<8x16xf32>
    %19 = arith.truncf %11 : vector<8x16xf32> to vector<8x16xbf16>
    %20 = arith.truncf %17 : vector<8x16xf32> to vector<8x16xbf16>
    %cst_13 = arith.constant dense<0.000000e+00> : vector<8x8xf32>
    %21 = tpu.matmul %19, %20, %cst_13 {dimension_numbers = #tpu.dot_dimension_numbers<[1], [1], [0], [0], [0, 0, 1, 0], [], []>} : vector<8x16xbf16>, vector<8x16xbf16>, vector<8x8xf32> -> vector<8x8xf32>
    %c0_14 = arith.constant 0 : index
    %c0_15 = arith.constant 0 : index
    %c0_16 = arith.constant 0 : index
    %22 = vector.load %arg3[%c0_14, %c0_15, %c0_16] : memref<1x1x8xf32, #tpu.memory_space<vmem>>, vector<1x1x8xf32>
    %23 = vector.shape_cast %22 : vector<1x1x8xf32> to vector<1x8xf32>
    %24 = vector.broadcast %23 : vector<1x8xf32> to vector<8x8xf32>
    %25 = arith.addf %21, %24 : vector<8x8xf32>
    %cst_17 = arith.constant dense<0xFF800000> : vector<8xf32>
    %26 = vector.multi_reduction <maximumf>, %25, %cst_17 [1] : vector<8x8xf32> to vector<8xf32>
    %27 = vector.shape_cast %26 : vector<8xf32> to vector<8x1xf32>
    %28 = vector.broadcast %27 : vector<8x1xf32> to vector<8x8xf32>
    %29 = arith.subf %25, %28 : vector<8x8xf32>
    %30 = math.exp %29 : vector<8x8xf32>
    %cst_18 = arith.constant dense<0.000000e+00> : vector<8xf32>
    %31 = vector.multi_reduction <add>, %30, %cst_18 [1] : vector<8x8xf32> to vector<8xf32>
    %32 = vector.shape_cast %31 : vector<8xf32> to vector<8x1xf32>
    %33 = arith.truncf %30 : vector<8x8xf32> to vector<8x8xbf16>
    %34 = arith.truncf %18 : vector<8x16xf32> to vector<8x16xbf16>
    %cst_19 = arith.constant dense<0.000000e+00> : vector<8x16xf32>
    %35 = tpu.matmul %33, %34, %cst_19 {dimension_numbers = #tpu.dot_dimension_numbers<[1], [0], [0], [1], [0, 0, 1, 1], [], []>} : vector<8x8xbf16>, vector<8x16xbf16>, vector<8x16xf32> -> vector<8x16xf32>
    %36 = tpu.reciprocal %32 {approx = true} : vector<8x1xf32> -> vector<8x1xf32>
    %37 = vector.broadcast %36 : vector<8x1xf32> to vector<8x16xf32>
    %38 = arith.mulf %35, %37 : vector<8x16xf32>
    %c0_20 = arith.constant 0 : index
    %c0_21 = arith.constant 0 : index
    %c0_22 = arith.constant 0 : index
    %39 = vector.load %arg8[%c0_20, %c0_21, %c0_22] : memref<1x8x16xf32, #tpu.memory_space<vmem>>, vector<1x8x16xf32>
    %40 = vector.shape_cast %39 : vector<1x8x16xf32> to vector<8x16xf32>
    %41 = vector.shape_cast %38 : vector<8x16xf32> to vector<1x8x16xf32>
    tpu.vector_store %arg8[%c0_20, %c0_21, %c0_22], %41 {strides = array<i32>} : memref<1x8x16xf32, #tpu.memory_space<vmem>>, vector<1x8x16xf32>,
    return
  }
  func.func @transform_0(%arg0: i32, %arg1: i32) -> (i32, i32, i32) {
    %c0_i32 = arith.constant 0 : i32
    %c0_i32_0 = arith.constant 0 : i32
    %c0_i32_1 = arith.constant 0 : i32
    return %arg0, %c0_i32, %c0_i32_0 : i32, i32, i32
  }
  func.func @transform_1(%arg0: i32, %arg1: i32) -> (i32, i32, i32) {
    %c0_i32 = arith.constant 0 : i32
    %c0_i32_0 = arith.constant 0 : i32
    %c0_i32_1 = arith.constant 0 : i32
    return %arg0, %c0_i32, %c0_i32_0 : i32, i32, i32
  }
  func.func @transform_2(%arg0: i32, %arg1: i32) -> (i32, i32) {
    %c0_i32 = arith.constant 0 : i32
    %c0_i32_0 = arith.constant 0 : i32
    %c0_i32_1 = arith.constant 0 : i32
    return %c0_i32, %c0_i32_0 : i32, i32
  }
  func.func @transform_3(%arg0: i32, %arg1: i32) -> (i32, i32) {
    %c0_i32 = arith.constant 0 : i32
    %c0_i32_0 = arith.constant 0 : i32
    %c0_i32_1 = arith.constant 0 : i32
    return %c0_i32, %c0_i32_0 : i32, i32
  }
  func.func @transform_4(%arg0: i32, %arg1: i32) -> (i32, i32) {
    %c0_i32 = arith.constant 0 : i32
    %c0_i32_0 = arith.constant 0 : i32
    %c0_i32_1 = arith.constant 0 : i32
    return %c0_i32, %c0_i32_0 : i32, i32
  }
  func.func @transform_5(%arg0: i32, %arg1: i32) -> (i32, i32) {
    %c0_i32 = arith.constant 0 : i32
    %c0_i32_0 = arith.constant 0 : i32
    %c0_i32_1 = arith.constant 0 : i32
    return %c0_i32, %c0_i32_0 : i32, i32
  }
  func.func @transform_6(%arg0: i32, %arg1: i32) -> (i32, i32, i32) {
    %c0_i32 = arith.constant 0 : i32
    %c0_i32_0 = arith.constant 0 : i32
    return %arg0, %arg1, %c0_i32 : i32, i32, i32
  }
}

</mosaic_0001>

<bundles_post_ra>
// kernel: tpu_custom_call.1
= control target key start
LH: loop header
LB: loop body
LE: loop exit
PB: predicated region body
PF: predicated region fallthrough
CT: control target
= control target key end

     0   :  { %11 = vsyncpa [#allocation3], 0  ;;  %s1022_s0 = inlined_call_operand.vmem [shape: bf16[2,8,32], index: 0, kind: input, shape index: {}]   ;;  %s1023_s1 = inlined_call_operand.vmem [shape: f32[2,1,8], index: 1, kind: input, shape index: {}]   ;;  %s1024_s2 = inlined_call_operand.vmem [shape: bf16[32,16], index: 2, kind: input, shape index: {}]   ;;  %s1025_s3 = inlined_call_operand.vmem [shape: f32[1,16], index: 3, kind: input, shape index: {}]   ;;  %s1026_s4 = inlined_call_operand.vmem [shape: bf16[32,32], index: 4, kind: input, shape index: {}]   ;;  %s1027_s5 = inlined_call_operand.vmem [shape: f32[1,32], index: 5, kind: input, shape index: {}]   ;;  %s1028_s6 = inlined_call_operand.hbm [shape: f32[2,8,16], index: 6, kind: output, shape index: {}]  }
   0x1   :  { %13 = vsyncpa [#allocation3 + $0x1], 0  ;;  %s875_s21 = smov 0   ;;  %s877_s22 = smov 0  }
   0x2   :  { %s879_s23 = smov 0   ;;  %s881_s24 = smov 0  }
   0x3   :  { %s883_s25 = smov 0   ;;  %s885_s26 = smov 0  }
   0x4 LB: > { %s630_s27 = sadd.s32 4294967295, %s834_s26   ;;  %s631_s28 = sadd.s32 4294967294, %s834_s26   ;;  %s834_s26 = sphi %s885_s26, %s19_s26   ;;  %s830_s25 = sphi %s883_s25, %s1035_s25   ;;  %s826_s24 = sphi %s881_s24, %s1034_s24   ;;  %s822_s23 = sphi %s879_s23, %s1033_s23   ;;  %s818_s22 = sphi %s877_s22, %s1032_s22   ;;  %s814_s21 = sphi %s875_s21, %s1031_s21  }
   0x5   : > { %s31_s29 = sadd.s32 1, %s830_s25  ;;  %s176_s30 = sadd.s32 1, %s822_s23 }
   0x6   : > { %p33_p0 = scmp.ge.s32.totalorder %s31_s29, 2  ;;  %p186_p1 = scmp.ne.s32.totalorder %s822_s23, %s818_s22 }
   0x7   : > { %p187_p2 = scmp.eq.s32.totalorder %s630_s27, 1  ;;  %p192_p3 = scmp.ne.s32.totalorder %s818_s22, %s814_s21 }
   0x8   : > { %s1037_s29 = smov (%p33_p0, %s31_s29), 0  ;;  %p193_p5 = scmp.eq.s32.totalorder %s631_s28, 1 }
   0x9   : > { %p915_p4 = por %p187_p2, %p186_p1  ;;  %s171_s8 = ssub.s32 %s830_s25, %s1037_s29 }
   0xa   : > { %p634_p6 = scmp.ge.s32.totalorder %s834_s26, 1  ;;  %p174_p7 = scmp.eq.s32.totalorder %s171_s8, 0 }
   0xb   : > { %p922_p8 = por %p193_p5, %p192_p3  ;;  %p236_p9 = scmp.lt.s32.totalorder %s834_s26, 3 }
   0xc   : > { %s928_s10 = scalar_select %p174_p7, %s822_s23, %s176_s30  }
   0xd   : > { %p237_p10 = pnand %p634_p6, %p236_p9 }
   0xe   : > { %v748_v0 = vld [vmem:[%s1026_s4] sm:$0xff] (!%p237_p10)   ;;  %v836_v1 = vmov (!%p237_p10), 0.0   ;;  %v749_v2 = vld [vmem:[%s1026_s4 + $0x8] sm:$0xff] (!%p237_p10)   ;;  %vm837_vm0 = vmmov (!%p237_p10), 0   ;;  %p268_p11 = scmp.lt.s32.totalorder (!%p237_p10), %s826_s24, 1  ;;  %vm306_vm1 = vcmask (!%p237_p10), 261120  }
   0xf   : > { %240 = sbr.rel (%p237_p10) target bundleno = 853 (0x355), region = 44  ;;  %670 = vmatprep.subr.bf16.mxu1 (!%p237_p10), %v836_v1  ;;  %662 = vmatprep.subr.bf16.mxu0 (!%p237_p10), %v836_v1  ;;  %v750_v3 = vld [vmem:[%s1024_s2] sm:$0xff] (!%p237_p10)   ;;  %v751_v4 = vld [vmem:[%s1024_s2 + $0x8] sm:$0xff] (!%p237_p10)   ;;  %vm425_vm2 = vcmask (!%p237_p10), 130048   ;;  %vm472_vm3 = vcmask (!%p237_p10), 64512   ;;  %s838_s18 = smov (!%p237_p10), 112  }
  0x10   : > { %671 = vmatpush3.bf16.msra.mxu1 (!%p237_p10), %v748_v0  ;;  %674 = vmatprep.mubr.msk.bf16.mxu1 (!%p237_p10), %vm837_vm0, %v836_v1  ;;  %v641_v7 = vld [vmem:[%s1027_s5] ss:$0 sm:$0xff] (!%p237_p10)  ;;  %vm489_vm4 = vcmask (!%p237_p10), 1043456   ;;  %s839_s13 = smov (!%p237_p10), [#allocation2]  }
  0x11   : > { %672 = vmatprep.subr.bf16.mxu1 (!%p237_p10), %v836_v1  ;;  %666 = vmatprep.mubr.msk.bf16.mxu0 (!%p237_p10), %vm837_vm0, %v836_v1  ;;  %v637_v12 = vld [vmem:[%s1025_s3] ss:$0 sm:$0xff] (!%p237_p10)  ;;  %s760_s14 = sshll.u32 (!%p237_p10), %s839_s13, 4  ;;  %s761_s14 = int_to_ptr.vmem [resolvable:$false] %s760_s14 }
  0x12   : > { %663 = vmatpush3.bf16.msra.mxu0 (!%p237_p10), %v750_v3  ;;  %s762_s15 = scalar_lea.vmem (!%p237_p10), %s761_s14, 256 }
  0x13   : > { %664 = vmatprep.subr.bf16.mxu0 (!%p237_p10), %v836_v1 }
  0x14   : > { %673 = vmatpush3.bf16.msra.mxu1 (!%p237_p10), %v749_v2 }
  0x15   : > { %684 = vmatprep.subr.bf16.mxu1 (!%p237_p10), %v836_v1 }
  0x16   : > { %s943_s17 = scalar_select %p268_p11, %s826_s24, 1  ;;  %665 = vmatpush3.bf16.msra.mxu0 %v751_v4 }
  0x17   : > { %678 = vmatprep.subr.bf16.mxu0 %v836_v1 }
  0x18   : > { %s636_s20 = sshll.u32 %s943_s17, 2  ;;  %s274_s16 = scalar_lea.vmem %s1023_s1, %s943_s17 }
  0x19   : > { %s271_s30 = scalar_lea.vmem %s1022_s0, %s636_s20  ;;  %v645_v22 = vld [vmem:[%s274_s16] ss:$0 sm:$0xff]  ;;  %s265_s17 = sand.u32 1, %s818_s22  }
  0x1a   : > { %v277_v5 = vld [vmem:[%s271_s30] sm:$0xf]  ;;  %s635_s19 = sshll.u32 %s265_s17, 3  ;;  %s649_s20 = sshll.u32 %s826_s24, 7 }
  0x1b   : > { %v282_v6 = vld [vmem:[%s271_s30] sm:$0xf]  ;;  %675 = vmatmul.mubr.msk.bf16.vlgmr.msra.gmra.mrb[0].mxu1 %vm306_vm1, %v277_v5  ;;  %s267_s27 = scalar_lea.vmem [#allocation2], %s635_s19  ;;  %s974_s11 = scalar_lea.hbm %s1028_s6, %s649_s20 }
  0x1c   : > { %686 = vmatprep.mubr.msk.bf16.mxu1 %vm837_vm0, %v836_v1  ;;  %667 = vmatmul.mubr.msk.bf16.vlgmr.msra.gmra.mrb[0].mxu0 %vm306_vm1, %v282_v6  ;;  %s551_s28 = sshll.u32 %s267_s27, 4  ;;  %s537_s24 = scalar_lea.sflag [#allocation3], %s265_s17  ;;  %s976_s28 = int_to_ptr.vmem [resolvable:$true] %s551_s28 }
  0x1d   : > { %680 = vmatprep.mubr.msk.bf16.mxu0 %vm837_vm0, %v836_v1  ;;  %s756_s12 = scalar_lea.vmem %s976_s28, 128  ;;  %p763_p1 = scmp.lt.s32.totalorder %s976_s28, %s761_s14 }
  0x1e   : > { %p757_p12 = scmp.ne.s32.totalorder %s976_s28, %s756_s12  ;;  %p764_p2 = scmp.lt.s32.totalorder %s762_s15, %s756_s12 }
  0x20   : > { %p758_p13 = pnand %p757_p12, %p915_p4  ;;  %p765_p3 = por %p764_p2, %p763_p1 }
  0x22   : > { %p759_p0 = pneg %p758_p13 }
  0x24   : > { %p766_p5 = pnand %p765_p3, %p759_p0 }
  0xee   : > { %v410_v8 = vpop.f32.mrb[0].mxu1 }
  0xef   : > { %v411_v9 = vadd.f32 %v641_v7, %v410_v8  ;;  %v676_v10 = vpop.f32.mrb[1].mxu1  ;;  %v344_v13 = vpop.f32.mrb[0].mxu0 }
  0xf0   : > { %v413_v11 = vpop.f32.mrb[2].mxu1  ;;  %v668_v16 = vpop.f32.mrb[1].mxu0  ;;  %v345_v19 = vadd.f32 %v637_v12, %v344_v13 }
  0xf1   : > { %v417_v14 = vpack.c.bf16 %v411_v9, %v411_v9  ;;  %v677_v15 = vpop.f32.mrb[3].mxu1  ;;  %v347_v17 = vpop.f32.mrb[2].mxu0 }
  0xf2   : > { %v669_v20 = vpop.f32.mrb[3].mxu0  ;;  %v416_v21 = vpack.c.bf16 %v345_v19, %v345_v19 }
  0xf3   : > { %v430_v18 = vsel %vm425_vm2, %v417_v14, 0 }
  0xf4   : > { %679 = vmatpush3.bf16.xpose.msra.mxu0 %v430_v18 }
  0xfb   : > { %681 = vmatmul.mubr.msk.bf16.vlgmr.msra.gmra.mrb[4].mxu0 %vm425_vm2, %v416_v21 }
 0x1ce   : > { %v466_v23 = vpop.f32.mrb[4].mxu0 }
 0x1cf   : > { %v467_v24 = vadd.f32 %v645_v22, %v466_v23  ;;  %v682_v25 = vpop.f32.mrb[5].mxu0 }
 0x1d0   : > { %v469_v26 = vpop.f32.mrb[6].mxu0 }
 0x1d1   : > { %v683_v27 = vpop.f32.mrb[7].mxu0  ;;  %v473_v28 = vsel %vm472_vm3, %v467_v24, -inf }
 0x1d2   : > { %474 = vmax.xlane.f32.xlu0 %v473_v28 }
 0x1e8   : > { %484 = vrot.lane.b32.xlu0 %v417_v14, %s838_s18 }
 0x25f   : > { %v475_v29 = vpop.xlane.xlu0 %474 }
 0x260   : > { %v476_v30 = vsub.f32 %v467_v24, %v475_v29 }
 0x262   : > { %v477_v31 = vmul.f32 1.442695, %v476_v30 }
 0x263   : > { %v485_v32 = vpop.permute.xlu0 %484 }
 0x264   : > { %752 = vpow2.f32 %v477_v31  ;;  %v491_v33 = vsel %vm489_vm4, %v485_v32, 0 }
 0x265   : > { %685 = vmatpush3.bf16.msra.mxu1 %v491_v33 }
 0x26e   : > { %v753_v34 = vpop.eup %752 }
 0x26f   : > { %v479_v35 = vsel %vm472_vm3, %v753_v34, 0.0  ;;  %v482_v36 = vpack.c.bf16 %v753_v34, %v753_v34 }
 0x270   : > { %480 = vadd.xlane.f32.xlu1 %v479_v35 }
 0x271   : > { %687 = vmatmul.mubr.msk.bf16.vlgmr.msra.gmra.mrb[4].mxu1 %vm472_vm3, %v482_v36 }
 0x2fd   : > { %v481_v37 = vpop.xlane.xlu1 %480 }
 0x2fe   : > { %754 = vrcp.f32 %v481_v37 }
 0x308   : > { %v755_v38 = vpop.eup %754 }
 0x344   : > { %v527_v39 = vpop.f32.mrb[4].mxu1 }
 0x345   : > { %v534_v40 = vmul.f32 %v755_v38, %v527_v39  ;;  %v688_v41 = vpop.f32.mrb[5].mxu1 }
 0x346   : > { %v530_v42 = vpop.f32.mrb[6].mxu1 }
 0x347   : > { %v689_v43 = vpop.f32.mrb[7].mxu1  ;;  %535 = vst.msk [vmem:[%s267_s27] sm:$0xff] %vm425_vm2, %v534_v40 }
 0x348   : > { %769 = shalt.err (!%p766_p5)
}
 0x349   : > { %s770_s16 = scalar_lea.hbm %s974_s11, 128  ;;  %s774_s19 = scalar_lea.hbm %s1028_s6, 256 }
 0x34a   : > { %p771_p6 = scmp.ne.s32.totalorder %s974_s11, %s770_s16  ;;  %p775_p10 = scmp.lt.u32.totalorder %s974_s11, %s1028_s6 }
 0x34b   : > { %p776_p11 = scmp.lt.u32.totalorder %s774_s19, %s770_s16  ;;  %p778_p13 = scmp.lt.u32.totalorder %s770_s16, %s974_s11 }
 0x34c   : > { %p772_p7 = pnand %p771_p6, %p915_p4 }
 0x34d   : > { %p777_p12 = por %p776_p11, %p775_p10 }
 0x34e   : > { %p773_p9 = pneg %p772_p7 }
 0x34f   : > { %p779_p0 = por %p778_p13, %p777_p12 }
 0x351   : > { %p780_p1 = pnand %p779_p0, %p773_p9 }
 0x353   : > { %783 = shalt.err (!%p780_p1)
}
 0x354   : > { %690 = dma.vmem_to_hbm [thread:$0]  (%p915_p4), %s976_s28, 128, %s974_s11, %s537_s24  }
 0x355 PF: > { %p696_p2 = scmp.ge.s32.totalorder %s834_s26, 2  ;;  %s563_s30 = sand.u32 1, %s814_s21  }
 0x356   : > { %s564_s8 = scalar_lea.sflag [#allocation3], %s563_s30 }
 0x357   : > { %p693_p3 = pnand %p696_p2, %p922_p8 }
 0x359   : > { %809 = dma.done.wait (!%p693_p3), %s564_s8, 128  }
 0x35a   : > { %811 = vsyncadd (!%p693_p3), %s564_s8, 4294967168  ;;  %s19_s26 = sadd.s32 1, %s834_s26   ;;  %s1031_s21 = smov %s818_s22 }
 0x35b   : > { %p16_p5 = scmp.ge.s32.totalorder %s19_s26, 4   ;;  %s1032_s22 = smov %s822_s23 }
 0x35c   : > { %s1033_s23 = smov %s928_s10  ;;  %s1034_s24 = smov %s830_s25 }
 0x35d   : > { %s1035_s25 = smov %s1037_s29  ;;  %18 = sbr.rel (!%p16_p5) target bundleno = 4 (0x4), region = 83 }
 0x364   :  { %569 = vsyncpa [#allocation3], 1 }
 0x365   :  { %571 = vsyncpa [#allocation3 + $0x1], 1 }

// kernel: tpu_custom_call.1
= control target key start
LH: loop header
LB: loop body
LE: loop exit
PB: predicated region body
PF: predicated region fallthrough
CT: control target
= control target key end

     0   :  { %11 = vsyncpa [#allocation3], 0  ;;  %s1022_s0 = inlined_call_operand.vmem [shape: bf16[2,8,32], index: 0, kind: input, shape index: {}]   ;;  %s1023_s1 = inlined_call_operand.vmem [shape: f32[2,1,8], index: 1, kind: input, shape index: {}]   ;;  %s1024_s2 = inlined_call_operand.vmem [shape: bf16[32,16], index: 2, kind: input, shape index: {}]   ;;  %s1025_s3 = inlined_call_operand.vmem [shape: f32[1,16], index: 3, kind: input, shape index: {}]   ;;  %s1026_s4 = inlined_call_operand.vmem [shape: bf16[32,32], index: 4, kind: input, shape index: {}]   ;;  %s1027_s5 = inlined_call_operand.vmem [shape: f32[1,32], index: 5, kind: input, shape index: {}]   ;;  %s1028_s6 = inlined_call_operand.hbm [shape: f32[2,8,16], index: 6, kind: output, shape index: {}]  }
   0x1   :  { %13 = vsyncpa [#allocation3 + $0x1], 0  ;;  %s875_s21 = smov 0   ;;  %s877_s22 = smov 0  }
   0x2   :  { %s879_s23 = smov 0   ;;  %s881_s24 = smov 0  }
   0x3   :  { %s883_s25 = smov 0   ;;  %s885_s26 = smov 0  }
   0x4 LB: > { %s630_s27 = sadd.s32 4294967295, %s834_s26   ;;  %s631_s28 = sadd.s32 4294967294, %s834_s26   ;;  %s834_s26 = sphi %s885_s26, %s19_s26   ;;  %s830_s25 = sphi %s883_s25, %s1035_s25   ;;  %s826_s24 = sphi %s881_s24, %s1034_s24   ;;  %s822_s23 = sphi %s879_s23, %s1033_s23   ;;  %s818_s22 = sphi %s877_s22, %s1032_s22   ;;  %s814_s21 = sphi %s875_s21, %s1031_s21  }
   0x5   : > { %s31_s29 = sadd.s32 1, %s830_s25  ;;  %s176_s30 = sadd.s32 1, %s822_s23 }
   0x6   : > { %p33_p0 = scmp.ge.s32.totalorder %s31_s29, 2  ;;  %p186_p1 = scmp.ne.s32.totalorder %s822_s23, %s818_s22 }
   0x7   : > { %p187_p2 = scmp.eq.s32.totalorder %s630_s27, 1  ;;  %p192_p3 = scmp.ne.s32.totalorder %s818_s22, %s814_s21 }
   0x8   : > { %s1037_s29 = smov (%p33_p0, %s31_s29), 0  ;;  %p193_p5 = scmp.eq.s32.totalorder %s631_s28, 1 }
   0x9   : > { %p915_p4 = por %p187_p2, %p186_p1  ;;  %s171_s8 = ssub.s32 %s830_s25, %s1037_s29 }
   0xa   : > { %p634_p6 = scmp.ge.s32.totalorder %s834_s26, 1  ;;  %p174_p7 = scmp.eq.s32.totalorder %s171_s8, 0 }
   0xb   : > { %p922_p8 = por %p193_p5, %p192_p3  ;;  %p236_p9 = scmp.lt.s32.totalorder %s834_s26, 3 }
   0xc   : > { %s928_s10 = scalar_select %p174_p7, %s822_s23, %s176_s30  }
   0xd   : > { %p237_p10 = pnand %p634_p6, %p236_p9 }
   0xe   : > { %v748_v0 = vld [vmem:[%s1026_s4] sm:$0xff] (!%p237_p10)   ;;  %v836_v1 = vmov (!%p237_p10), 0.0   ;;  %v749_v2 = vld [vmem:[%s1026_s4 + $0x8] sm:$0xff] (!%p237_p10)   ;;  %vm837_vm0 = vmmov (!%p237_p10), 0   ;;  %p268_p11 = scmp.lt.s32.totalorder (!%p237_p10), %s826_s24, 1  ;;  %vm306_vm1 = vcmask (!%p237_p10), 261120  }
   0xf   : > { %240 = sbr.rel (%p237_p10) target bundleno = 853 (0x355), region = 44  ;;  %670 = vmatprep.subr.bf16.mxu1 (!%p237_p10), %v836_v1  ;;  %662 = vmatprep.subr.bf16.mxu0 (!%p237_p10), %v836_v1  ;;  %v750_v3 = vld [vmem:[%s1024_s2] sm:$0xff] (!%p237_p10)   ;;  %v751_v4 = vld [vmem:[%s1024_s2 + $0x8] sm:$0xff] (!%p237_p10)   ;;  %vm425_vm2 = vcmask (!%p237_p10), 130048   ;;  %vm472_vm3 = vcmask (!%p237_p10), 64512   ;;  %s838_s18 = smov (!%p237_p10), 112  }
  0x10   : > { %671 = vmatpush3.bf16.msra.mxu1 (!%p237_p10), %v748_v0  ;;  %674 = vmatprep.mubr.msk.bf16.mxu1 (!%p237_p10), %vm837_vm0, %v836_v1  ;;  %v641_v7 = vld [vmem:[%s1027_s5] ss:$0 sm:$0xff] (!%p237_p10)  ;;  %vm489_vm4 = vcmask (!%p237_p10), 1043456   ;;  %s839_s13 = smov (!%p237_p10), [#allocation2]  }
  0x11   : > { %672 = vmatprep.subr.bf16.mxu1 (!%p237_p10), %v836_v1  ;;  %666 = vmatprep.mubr.msk.bf16.mxu0 (!%p237_p10), %vm837_vm0, %v836_v1  ;;  %v637_v12 = vld [vmem:[%s1025_s3] ss:$0 sm:$0xff] (!%p237_p10)  ;;  %s760_s14 = sshll.u32 (!%p237_p10), %s839_s13, 4  ;;  %s761_s14 = int_to_ptr.vmem [resolvable:$false] %s760_s14 }
  0x12   : > { %663 = vmatpush3.bf16.msra.mxu0 (!%p237_p10), %v750_v3  ;;  %s762_s15 = scalar_lea.vmem (!%p237_p10), %s761_s14, 256 }
  0x13   : > { %664 = vmatprep.subr.bf16.mxu0 (!%p237_p10), %v836_v1 }
  0x14   : > { %673 = vmatpush3.bf16.msra.mxu1 (!%p237_p10), %v749_v2 }
  0x15   : > { %684 = vmatprep.subr.bf16.mxu1 (!%p237_p10), %v836_v1 }
  0x16   : > { %s943_s17 = scalar_select %p268_p11, %s826_s24, 1  ;;  %665 = vmatpush3.bf16.msra.mxu0 %v751_v4 }
  0x17   : > { %678 = vmatprep.subr.bf16.mxu0 %v836_v1 }
  0x18   : > { %s636_s20 = sshll.u32 %s943_s17, 2  ;;  %s274_s16 = scalar_lea.vmem %s1023_s1, %s943_s17 }
  0x19   : > { %s271_s30 = scalar_lea.vmem %s1022_s0, %s636_s20  ;;  %v645_v22 = vld [vmem:[%s274_s16] ss:$0 sm:$0xff]  ;;  %s265_s17 = sand.u32 1, %s818_s22  }
  0x1a   : > { %v277_v5 = vld [vmem:[%s271_s30] sm:$0xf]  ;;  %s635_s19 = sshll.u32 %s265_s17, 3  ;;  %s649_s20 = sshll.u32 %s826_s24, 7 }
  0x1b   : > { %v282_v6 = vld [vmem:[%s271_s30] sm:$0xf]  ;;  %675 = vmatmul.mubr.msk.bf16.vlgmr.msra.gmra.mrb[0].mxu1 %vm306_vm1, %v277_v5  ;;  %s267_s27 = scalar_lea.vmem [#allocation2], %s635_s19  ;;  %s974_s11 = scalar_lea.hbm %s1028_s6, %s649_s20 }
  0x1c   : > { %686 = vmatprep.mubr.msk.bf16.mxu1 %vm837_vm0, %v836_v1  ;;  %667 = vmatmul.mubr.msk.bf16.vlgmr.msra.gmra.mrb[0].mxu0 %vm306_vm1, %v282_v6  ;;  %s551_s28 = sshll.u32 %s267_s27, 4  ;;  %s537_s24 = scalar_lea.sflag [#allocation3], %s265_s17  ;;  %s976_s28 = int_to_ptr.vmem [resolvable:$true] %s551_s28 }
  0x1d   : > { %680 = vmatprep.mubr.msk.bf16.mxu0 %vm837_vm0, %v836_v1  ;;  %s756_s12 = scalar_lea.vmem %s976_s28, 128  ;;  %p763_p1 = scmp.lt.s32.totalorder %s976_s28, %s761_s14 }
  0x1e   : > { %p757_p12 = scmp.ne.s32.totalorder %s976_s28, %s756_s12  ;;  %p764_p2 = scmp.lt.s32.totalorder %s762_s15, %s756_s12 }
  0x20   : > { %p758_p13 = pnand %p757_p12, %p915_p4  ;;  %p765_p3 = por %p764_p2, %p763_p1 }
  0x22   : > { %p759_p0 = pneg %p758_p13 }
  0x24   : > { %p766_p5 = pnand %p765_p3, %p759_p0 }
  0xee   : > { %v410_v8 = vpop.f32.mrb[0].mxu1 }
  0xef   : > { %v411_v9 = vadd.f32 %v641_v7, %v410_v8  ;;  %v676_v10 = vpop.f32.mrb[1].mxu1  ;;  %v344_v13 = vpop.f32.mrb[0].mxu0 }
  0xf0   : > { %v413_v11 = vpop.f32.mrb[2].mxu1  ;;  %v668_v16 = vpop.f32.mrb[1].mxu0  ;;  %v345_v19 = vadd.f32 %v637_v12, %v344_v13 }
  0xf1   : > { %v417_v14 = vpack.c.bf16 %v411_v9, %v411_v9  ;;  %v677_v15 = vpop.f32.mrb[3].mxu1  ;;  %v347_v17 = vpop.f32.mrb[2].mxu0 }
  0xf2   : > { %v669_v20 = vpop.f32.mrb[3].mxu0  ;;  %v416_v21 = vpack.c.bf16 %v345_v19, %v345_v19 }
  0xf3   : > { %v430_v18 = vsel %vm425_vm2, %v417_v14, 0 }
  0xf4   : > { %679 = vmatpush3.bf16.xpose.msra.mxu0 %v430_v18 }
  0xfb   : > { %681 = vmatmul.mubr.msk.bf16.vlgmr.msra.gmra.mrb[4].mxu0 %vm425_vm2, %v416_v21 }
 0x1ce   : > { %v466_v23 = vpop.f32.mrb[4].mxu0 }
 0x1cf   : > { %v467_v24 = vadd.f32 %v645_v22, %v466_v23  ;;  %v682_v25 = vpop.f32.mrb[5].mxu0 }
 0x1d0   : > { %v469_v26 = vpop.f32.mrb[6].mxu0 }
 0x1d1   : > { %v683_v27 = vpop.f32.mrb[7].mxu0  ;;  %v473_v28 = vsel %vm472_vm3, %v467_v24, -inf }
 0x1d2   : > { %474 = vmax.xlane.f32.xlu0 %v473_v28 }
 0x1e8   : > { %484 = vrot.lane.b32.xlu0 %v417_v14, %s838_s18 }
 0x25f   : > { %v475_v29 = vpop.xlane.xlu0 %474 }
 0x260   : > { %v476_v30 = vsub.f32 %v467_v24, %v475_v29 }
 0x262   : > { %v477_v31 = vmul.f32 1.442695, %v476_v30 }
 0x263   : > { %v485_v32 = vpop.permute.xlu0 %484 }
 0x264   : > { %752 = vpow2.f32 %v477_v31  ;;  %v491_v33 = vsel %vm489_vm4, %v485_v32, 0 }
 0x265   : > { %685 = vmatpush3.bf16.msra.mxu1 %v491_v33 }
 0x26e   : > { %v753_v34 = vpop.eup %752 }
 0x26f   : > { %v479_v35 = vsel %vm472_vm3, %v753_v34, 0.0  ;;  %v482_v36 = vpack.c.bf16 %v753_v34, %v753_v34 }
 0x270   : > { %480 = vadd.xlane.f32.xlu1 %v479_v35 }
 0x271   : > { %687 = vmatmul.mubr.msk.bf16.vlgmr.msra.gmra.mrb[4].mxu1 %vm472_vm3, %v482_v36 }
 0x2fd   : > { %v481_v37 = vpop.xlane.xlu1 %480 }
 0x2fe   : > { %754 = vrcp.f32 %v481_v37 }
 0x308   : > { %v755_v38 = vpop.eup %754 }
 0x344   : > { %v527_v39 = vpop.f32.mrb[4].mxu1 }
 0x345   : > { %v534_v40 = vmul.f32 %v755_v38, %v527_v39  ;;  %v688_v41 = vpop.f32.mrb[5].mxu1 }
 0x346   : > { %v530_v42 = vpop.f32.mrb[6].mxu1 }
 0x347   : > { %v689_v43 = vpop.f32.mrb[7].mxu1  ;;  %535 = vst.msk [vmem:[%s267_s27] sm:$0xff] %vm425_vm2, %v534_v40 }
 0x348   : > { %769 = shalt.err (!%p766_p5)
}
 0x349   : > { %s770_s16 = scalar_lea.hbm %s974_s11, 128  ;;  %s774_s19 = scalar_lea.hbm %s1028_s6, 256 }
 0x34a   : > { %p771_p6 = scmp.ne.s32.totalorder %s974_s11, %s770_s16  ;;  %p775_p10 = scmp.lt.u32.totalorder %s974_s11, %s1028_s6 }
 0x34b   : > { %p776_p11 = scmp.lt.u32.totalorder %s774_s19, %s770_s16  ;;  %p778_p13 = scmp.lt.u32.totalorder %s770_s16, %s974_s11 }
 0x34c   : > { %p772_p7 = pnand %p771_p6, %p915_p4 }
 0x34d   : > { %p777_p12 = por %p776_p11, %p775_p10 }
 0x34e   : > { %p773_p9 = pneg %p772_p7 }
 0x34f   : > { %p779_p0 = por %p778_p13, %p777_p12 }
 0x351   : > { %p780_p1 = pnand %p779_p0, %p773_p9 }
 0x353   : > { %783 = shalt.err (!%p780_p1)
}
 0x354   : > { %690 = dma.vmem_to_hbm [thread:$0]  (%p915_p4), %s976_s28, 128, %s974_s11, %s537_s24  }
 0x355 PF: > { %p696_p2 = scmp.ge.s32.totalorder %s834_s26, 2  ;;  %s563_s30 = sand.u32 1, %s814_s21  }
 0x356   : > { %s564_s8 = scalar_lea.sflag [#allocation3], %s563_s30 }
 0x357   : > { %p693_p3 = pnand %p696_p2, %p922_p8 }
 0x359   : > { %809 = dma.done.wait (!%p693_p3), %s564_s8, 128  }
 0x35a   : > { %811 = vsyncadd (!%p693_p3), %s564_s8, 4294967168  ;;  %s19_s26 = sadd.s32 1, %s834_s26   ;;  %s1031_s21 = smov %s818_s22 }
 0x35b   : > { %p16_p5 = scmp.ge.s32.totalorder %s19_s26, 4   ;;  %s1032_s22 = smov %s822_s23 }
 0x35c   : > { %s1033_s23 = smov %s928_s10  ;;  %s1034_s24 = smov %s830_s25 }
 0x35d   : > { %s1035_s25 = smov %s1037_s29  ;;  %18 = sbr.rel (!%p16_p5) target bundleno = 4 (0x4), region = 83 }
 0x364   :  { %569 = vsyncpa [#allocation3], 1 }
 0x365   :  { %571 = vsyncpa [#allocation3 + $0x1], 1 }

</bundles_post_ra>
